<compile_context>
chip_gen: v6e
topology: v6e:2x2x1
jax: 0.10.0
libtpu: 0.0.40
codegen_flags: <defaults>
</compile_context>

<pallas_src>
import jax
import jax.numpy as jnp
from jax.experimental import pallas as pl
from jax.experimental.pallas import tpu as pltpu


# ---------------------------------------------------------------------------
# Kernels
# ---------------------------------------------------------------------------
def _matvec_bias_kernel(x_ref, w_ref, b_ref, o_ref):
    """output_size == 1 path: VPU multiply + XLU lane reduction + SMEM bias.

    x_ref: (tm, K) VMEM, w_ref: (1, K) VMEM, b_ref: (1, 1) SMEM, o_ref: (tm, 1).
    """
    x = x_ref[...].astype(jnp.float32)
    w = w_ref[...].astype(jnp.float32)              # broadcast over rows
    acc = jnp.sum(x * w, axis=-1, keepdims=True)    # (tm, 1), XLU lane reduce
    o_ref[...] = (acc + b_ref[0, 0]).astype(o_ref.dtype)


def _matmul_bias_kernel(x_ref, w_ref, b_ref, o_ref):
    """General output_size path: MXU matmul + broadcast bias add.

    x_ref: (tm, K), w_ref: (K, N), b_ref: (1, N), o_ref: (tm, N).
    """
    acc = jnp.dot(x_ref[...], w_ref[...], preferred_element_type=jnp.float32)
    o_ref[...] = (acc + b_ref[...].astype(jnp.float32)).astype(o_ref.dtype)


# ---------------------------------------------------------------------------
# Sizing helpers
# ---------------------------------------------------------------------------
_MiB = 1024 * 1024
_VMEM_LIMIT_CACHE = []          # lazily detected, cached per process
_SINGLE_BUFFER_CONSTS = [True]  # flipped off once if pl.Buffered(1) unsupported


def _round8(v):
    return ((v + 7) // 8) * 8


def _pick_vmem_limit():
    """Scoped VMEM limit: ~half of physical, capped at 64 MiB.

    -> 64 MiB on v5e/v6e (128 MiB physical), ~32 MiB on v7x (64 MiB per TC).
    """
    if not _VMEM_LIMIT_CACHE:
        try:
            phys = int(pltpu.get_tpu_info().vmem_capacity_bytes)
        except Exception:
            phys = 64 * _MiB            # conservative: assume v7x-sized VMEM
        _VMEM_LIMIT_CACHE.append(
            int(min(64 * _MiB, max(16 * _MiB, phys // 2))))
    return _VMEM_LIMIT_CACHE[0]


def _choose_row_tile(M, K, N, itemsize, vmem_limit, reserved_bytes):
    """Pick the row tile (tm).

    Sized by bytes, not rows: target ~4 MiB per x buffer (enough to amortize
    the ~0.35us per-grid-step overhead and reach the HBM roofline), with lane
    padding (last dim occupies >= 128 lanes in VMEM) folded into the budget,
    and capped so double-buffered x + double-buffered out + resident consts
    stay under the scoped VMEM limit.
    """
    lanes_in = max(K, 128)               # VMEM lane padding of the x tile
    lanes_out = max(N, 128)              # VMEM lane padding of the out tile
    tm_target = (4 * _MiB) // (lanes_in * itemsize)

    per_row = 2 * (lanes_in + lanes_out) * itemsize   # x + out, double-buffered
    budget = vmem_limit - reserved_bytes - 2 * _MiB   # headroom for internals
    tm_cap = budget // per_row

    tm = max(8, (min(tm_target, tm_cap) // 8) * 8)    # sublane multiple

    if tm >= M:
        if M >= 16:
            # Guarantee >= 2 row tiles so the "parallel" M axis can shard
            # across v7x's two TensorCores (costs ~nothing when memory-bound).
            tm = _round8(pl.cdiv(M, 2))
        else:
            tm = M                        # block == full dim is always legal
    return tm


# ---------------------------------------------------------------------------
# pallas_call wrapper
# ---------------------------------------------------------------------------
def _linear_call(x2d, w_t, b, tm, grid_m, vmem_limit, single_buffer_consts):
    M, K = x2d.shape
    N = w_t.shape[1]
    itemsize = jnp.dtype(x2d.dtype).itemsize

    cost = pl.CostEstimate(
        flops=2 * M * K * N,
        transcendentals=0,
        bytes_accessed=itemsize * (M * K + K * N + M * N),
    )
    cparams = pltpu.CompilerParams(
        dimension_semantics=("parallel",),   # shard M tiles across TCs (v7x)
        vmem_limit_bytes=vmem_limit,
    )

    def const_spec(shape, index_map):
        # Constant-index blocks: never re-fetched, so single-buffer them to
        # free VMEM for a larger row tile.
        if single_buffer_consts:
            return pl.BlockSpec(shape, index_map, pipeline_mode=pl.Buffered(1))
        return pl.BlockSpec(shape, index_map)

    if N == 1:
        # VPU/XLU matvec path — MXU would be <1% utilized for a single column.
        w_row = w_t.reshape(1, K)
        b_scalar = b.reshape(1, 1).astype(jnp.float32)
        return pl.pallas_call(
            _matvec_bias_kernel,
            out_shape=jax.ShapeDtypeStruct((M, 1), x2d.dtype),
            grid_spec=pltpu.PrefetchScalarGridSpec(
                num_scalar_prefetch=0,
                grid=(grid_m,),
                in_specs=[
                    pl.BlockSpec((tm, K), lambda i: (i, 0)),
                    const_spec((1, K), lambda i: (0, 0)),
                    pl.BlockSpec(memory_space=pltpu.MemorySpace.SMEM),
                ],
                out_specs=pl.BlockSpec((tm, 1), lambda i: (i, 0)),
            ),
            compiler_params=cparams,
            cost_estimate=cost,
        )(x2d, w_row, b_scalar)

    # MXU path for wider (lane-dense, padded at init) outputs.
    b_row = b.reshape(1, N)
    return pl.pallas_call(
        _matmul_bias_kernel,
        out_shape=jax.ShapeDtypeStruct((M, N), x2d.dtype),
        grid_spec=pltpu.PrefetchScalarGridSpec(
            num_scalar_prefetch=0,
            grid=(grid_m,),
            in_specs=[
                pl.BlockSpec((tm, K), lambda i: (i, 0)),
                const_spec((K, N), lambda i: (0, 0)),
                const_spec((1, N), lambda i: (0, 0)),
            ],
            out_specs=pl.BlockSpec((tm, N), lambda i: (i, 0)),
        ),
        compiler_params=cparams,
        cost_estimate=cost,
    )(x2d, w_t, b_row)


def linear_pallas(x2d, w_t, b):
    """y = x2d @ w_t + b, with x2d: (M, K), w_t: (K, N), b: (N,)."""
    M, K = x2d.shape
    Kw, N = w_t.shape
    assert K == Kw

    itemsize = jnp.dtype(x2d.dtype).itemsize
    vmem_limit = _pick_vmem_limit()

    # Resident constant blocks (assume double-buffered worst case when sizing).
    if N == 1:
        reserved = 2 * 8 * max(K, 128) * itemsize
    else:
        reserved = 2 * (_round8(K) + 8) * max(N, 128) * itemsize

    tm = _choose_row_tile(M, K, N, itemsize, vmem_limit, reserved)
    grid_m = pl.cdiv(M, tm)   # ragged last block handled (masked) by Pallas

    if _SINGLE_BUFFER_CONSTS[0]:
        try:
            return _linear_call(x2d, w_t, b, tm, grid_m, vmem_limit, True)
        except Exception:
            # pl.Buffered(1) not supported on this JAX/Mosaic build; fall back
            # to default double-buffering (correctness unaffected).
            _SINGLE_BUFFER_CONSTS[0] = False
    return _linear_call(x2d, w_t, b, tm, grid_m, vmem_limit, False)


# ---------------------------------------------------------------------------
# Module wrapper
# ---------------------------------------------------------------------------
class FCPallas:
    """Pallas port of the PyTorch FC module."""

    def __init__(self, input_size, output_size=1, key=None):
        if key is None:
            key = jax.random.PRNGKey(0)
        keys = jax.random.split(key, 6)
        # nn.Linear default init: U(-1/sqrt(in), 1/sqrt(in)) for W and b.
        bound = 1.0 / jnp.sqrt(jnp.float32(input_size))

        def init_layer(kw, kb):
            w = jax.random.uniform(kw, (output_size, input_size),
                                   jnp.float32, -bound, bound)
            b = jax.random.uniform(kb, (output_size,),
                                   jnp.float32, -bound, bound)
            w_t = w.T                       # pre-transpose to (K, N)
            # One-time lane-dense padding for 1 < N < 128 so the MXU path
            # stores full 128-lane vregs instead of masked partial stores.
            if 1 < output_size < 128:
                pad = 128 - output_size
                w_t = jnp.pad(w_t, ((0, 0), (0, pad)))
                b = jnp.pad(b, (0, pad))
            return w_t, b, output_size

        self.params = {
            1: init_layer(keys[0], keys[1]),   # fc_dt1
            2: init_layer(keys[2], keys[3]),   # fc_dt2
            4: init_layer(keys[4], keys[5]),   # fc_dt4
        }

    def __call__(self, x, difference=1):
        # Static Python dispatch, same as the PyTorch forward's if/elif chain.
        w_t, b, n_out = self.params[difference]
        lead = x.shape[:-1]
        K = x.shape[-1]
        x2d = x.reshape(-1, K)
        y2d = linear_pallas(x2d, w_t, b)
        if y2d.shape[1] != n_out:           # drop init-time lane padding
            y2d = y2d[:, :n_out]
        return y2d.reshape(lead + (n_out,))


# ---------------------------------------------------------------------------
# Self-test
# ---------------------------------------------------------------------------
if __name__ == "__main__":
    key = jax.random.PRNGKey(0)
    k_in, k_in2, k_mod, k_mod4 = jax.random.split(key, 4)

    batch, seq, hidden = 2, 8, 32   # input_size=32, output_size=1 (default)
    x = jax.random.normal(k_in, (batch, seq, hidden), jnp.float32)

    fc = FCPallas(input_size=hidden, output_size=1, key=k_mod)

    # All three branches of the forward dispatch, checked vs plain JAX.
    for diff in (1, 2, 4):
        y = jax.block_until_ready(fc(x, difference=diff))
        w_t, b, n_out = fc.params[diff]
        y_ref = (x.reshape(-1, hidden) @ w_t + b)[:, :n_out]
        y_ref = y_ref.reshape(batch, seq, n_out)
        assert y.shape == (batch, seq, 1)
        assert jnp.allclose(y, y_ref, atol=1e-5, rtol=1e-5)

    # Ragged row count (M=18 not a multiple of the row tile): exercises the
    # masked last block now that the wrapper-side pad/slice is gone.
    x_r = jax.random.normal(k_in2, (batch, 9, hidden), jnp.float32)
    y_r = jax.block_until_ready(fc(x_r, difference=2))
    w_t, b, n_out = fc.params[2]
    y_r_ref = ((x_r.reshape(-1, hidden) @ w_t + b)[:, :n_out]
               .reshape(batch, 9, n_out))
    assert y_r.shape == (batch, 9, 1)
    assert jnp.allclose(y_r, y_r_ref, atol=1e-5, rtol=1e-5)

    # Wider output: exercises the MXU path with init-time N->128 padding.
    fc4 = FCPallas(input_size=hidden, output_size=4, key=k_mod4)
    y4 = jax.block_until_ready(fc4(x, difference=4))
    w_t4, b4, n_out4 = fc4.params[4]
    y4_ref = ((x.reshape(-1, hidden) @ w_t4 + b4)[:, :n_out4]
              .reshape(batch, seq, n_out4))
    assert y4.shape == (batch, seq, 4)
    assert jnp.allclose(y4, y4_ref, atol=1e-5, rtol=1e-5)

    print("KERNEL_OK")
</pallas_src>

<mosaic_0001>
module attributes {stable_mosaic.version = 11 : i64} {
  func.func @_matvec_bias_kernel(%arg0: i32, %arg1: memref<8x32xf32, #tpu.memory_space<vmem>>, %arg2: memref<1x32xf32, #tpu.memory_space<vmem>>, %arg3: memref<1x1xf32, #tpu.memory_space<smem>>, %arg4: memref<8x1xf32, #tpu.memory_space<vmem>>) attributes {dimension_semantics = [#tpu.dimension_semantics<parallel>], iteration_bounds = array<i64: 2>, scalar_prefetch = 0 : i64, scratch_operands = 0 : i64, tpu.core_type = #tpu.core_type<tc>, window_params = [{transform_indices = @transform_0, window_bounds = array<i64: 8, 32>}, {pipeline_mode = #tpu.pipeline_mode<synchronous>, transform_indices = @transform_1, window_bounds = array<i64: 1, 32>}, {transform_indices = @transform_2, window_bounds = array<i64: 1, 1>}, {transform_indices = @transform_3, window_bounds = array<i64: 8, 1>}]} {
    %c0 = arith.constant 0 : index
    %c0_0 = arith.constant 0 : index
    %0 = vector.load %arg1[%c0, %c0_0] : memref<8x32xf32, #tpu.memory_space<vmem>>, vector<8x32xf32>
    %c0_1 = arith.constant 0 : index
    %c0_2 = arith.constant 0 : index
    %1 = vector.load %arg2[%c0_1, %c0_2] : memref<1x32xf32, #tpu.memory_space<vmem>>, vector<1x32xf32>
    %2 = vector.broadcast %1 : vector<1x32xf32> to vector<8x32xf32>
    %3 = arith.mulf %0, %2 : vector<8x32xf32>
    %cst = arith.constant dense<0.000000e+00> : vector<8xf32>
    %4 = vector.multi_reduction <add>, %3, %cst [1] : vector<8x32xf32> to vector<8xf32>
    %5 = vector.shape_cast %4 : vector<8xf32> to vector<8x1xf32>
    %c0_3 = arith.constant 0 : index
    %c0_4 = arith.constant 0 : index
    %6 = memref.load %arg3[%c0_3, %c0_4] : memref<1x1xf32, #tpu.memory_space<smem>>
    %7 = vector.broadcast %6 : f32 to vector<8x1xf32>
    %8 = arith.addf %5, %7 : vector<8x1xf32>
    %c0_5 = arith.constant 0 : index
    %c0_6 = arith.constant 0 : index
    %9 = vector.load %arg4[%c0_5, %c0_6] : memref<8x1xf32, #tpu.memory_space<vmem>>, vector<8x1xf32>
    tpu.vector_store %arg4[%c0_5, %c0_6], %8 {strides = array<i32>} : memref<8x1xf32, #tpu.memory_space<vmem>>, vector<8x1xf32>,
    return
  }
  func.func @transform_0(%arg0: i32) -> (i32, i32) {
    %c0_i32 = arith.constant 0 : i32
    %c0_i32_0 = arith.constant 0 : i32
    return %arg0, %c0_i32 : i32, i32
  }
  func.func @transform_1(%arg0: i32) -> (i32, i32) {
    %c0_i32 = arith.constant 0 : i32
    %c0_i32_0 = arith.constant 0 : i32
    %c0_i32_1 = arith.constant 0 : i32
    return %c0_i32, %c0_i32_0 : i32, i32
  }
  func.func @transform_2(%arg0: i32) -> (i32, i32) {
    %c0_i32 = arith.constant 0 : i32
    %c0_i32_0 = arith.constant 0 : i32
    %c0_i32_1 = arith.constant 0 : i32
    return %c0_i32, %c0_i32_0 : i32, i32
  }
  func.func @transform_3(%arg0: i32) -> (i32, i32) {
    %c0_i32 = arith.constant 0 : i32
    %c0_i32_0 = arith.constant 0 : i32
    return %arg0, %c0_i32 : i32, i32
  }
}

module attributes {stable_mosaic.version = 11 : i64} {
  func.func @_matvec_bias_kernel(%arg0: i32, %arg1: memref<8x32xf32, #tpu.memory_space<vmem>>, %arg2: memref<1x32xf32, #tpu.memory_space<vmem>>, %arg3: memref<1x1xf32, #tpu.memory_space<smem>>, %arg4: memref<8x1xf32, #tpu.memory_space<vmem>>) attributes {dimension_semantics = [#tpu.dimension_semantics<parallel>], iteration_bounds = array<i64: 2>, scalar_prefetch = 0 : i64, scratch_operands = 0 : i64, tpu.core_type = #tpu.core_type<tc>, window_params = [{transform_indices = @transform_0, window_bounds = array<i64: 8, 32>}, {pipeline_mode = #tpu.pipeline_mode<synchronous>, transform_indices = @transform_1, window_bounds = array<i64: 1, 32>}, {transform_indices = @transform_2, window_bounds = array<i64: 1, 1>}, {transform_indices = @transform_3, window_bounds = array<i64: 8, 1>}]} {
    %c0 = arith.constant 0 : index
    %c0_0 = arith.constant 0 : index
    %0 = vector.load %arg1[%c0, %c0_0] : memref<8x32xf32, #tpu.memory_space<vmem>>, vector<8x32xf32>
    %c0_1 = arith.constant 0 : index
    %c0_2 = arith.constant 0 : index
    %1 = vector.load %arg2[%c0_1, %c0_2] : memref<1x32xf32, #tpu.memory_space<vmem>>, vector<1x32xf32>
    %2 = vector.broadcast %1 : vector<1x32xf32> to vector<8x32xf32>
    %3 = arith.mulf %0, %2 : vector<8x32xf32>
    %cst = arith.constant dense<0.000000e+00> : vector<8xf32>
    %4 = vector.multi_reduction <add>, %3, %cst [1] : vector<8x32xf32> to vector<8xf32>
    %5 = vector.shape_cast %4 : vector<8xf32> to vector<8x1xf32>
    %c0_3 = arith.constant 0 : index
    %c0_4 = arith.constant 0 : index
    %6 = memref.load %arg3[%c0_3, %c0_4] : memref<1x1xf32, #tpu.memory_space<smem>>
    %7 = vector.broadcast %6 : f32 to vector<8x1xf32>
    %8 = arith.addf %5, %7 : vector<8x1xf32>
    %c0_5 = arith.constant 0 : index
    %c0_6 = arith.constant 0 : index
    %9 = vector.load %arg4[%c0_5, %c0_6] : memref<8x1xf32, #tpu.memory_space<vmem>>, vector<8x1xf32>
    tpu.vector_store %arg4[%c0_5, %c0_6], %8 {strides = array<i32>} : memref<8x1xf32, #tpu.memory_space<vmem>>, vector<8x1xf32>,
    return
  }
  func.func @transform_0(%arg0: i32) -> (i32, i32) {
    %c0_i32 = arith.constant 0 : i32
    %c0_i32_0 = arith.constant 0 : i32
    return %arg0, %c0_i32 : i32, i32
  }
  func.func @transform_1(%arg0: i32) -> (i32, i32) {
    %c0_i32 = arith.constant 0 : i32
    %c0_i32_0 = arith.constant 0 : i32
    %c0_i32_1 = arith.constant 0 : i32
    return %c0_i32, %c0_i32_0 : i32, i32
  }
  func.func @transform_2(%arg0: i32) -> (i32, i32) {
    %c0_i32 = arith.constant 0 : i32
    %c0_i32_0 = arith.constant 0 : i32
    %c0_i32_1 = arith.constant 0 : i32
    return %c0_i32, %c0_i32_0 : i32, i32
  }
  func.func @transform_3(%arg0: i32) -> (i32, i32) {
    %c0_i32 = arith.constant 0 : i32
    %c0_i32_0 = arith.constant 0 : i32
    return %arg0, %c0_i32 : i32, i32
  }
}

</mosaic_0001>

<bundles_post_ra>
// kernel: tpu_custom_call.1
= control target key start
LH: loop header
LB: loop body
LE: loop exit
PB: predicated region body
PF: predicated region fallthrough
CT: control target
= control target key end

     0   :  { %s511_s0 = inlined_call_operand.hbm [shape: f32[16,32], index: 0, kind: input, shape index: {}]   ;;  %s512_s1 = inlined_call_operand.vmem [shape: f32[1,32], index: 1, kind: input, shape index: {}]   ;;  %s513_s2 = inlined_call_operand.<no memory space> [shape: f32[1,1], index: 2, kind: input, shape index: {}]   ;;  %s514_s3 = inlined_call_operand.vmem [shape: f32[16,1], index: 3, kind: output, shape index: {}]  }
   0x1   :  { %8 = sst [smem:[#allocation2]] %s513_s2 }
   0x2   :  { %9 = vsyncpa [#allocation4], 0 }
   0x3   :  { %11 = vsyncpa [#allocation4 + $0x1], 0  ;;  %s408_s14 = smov 0   ;;  %s410_s15 = smov 0  }
   0x4   :  { %s412_s16 = smov 0   ;;  %s414_s17 = smov 0  }
   0x5 LB: > { %s427_s2 = sadd.s32 4294967295, %s382_s17   ;;  %s430_s18 = sadd.s32 1, %s382_s17   ;;  %s382_s17 = sphi %s414_s17, %s524_s17   ;;  %s378_s16 = sphi %s412_s16, %s523_s16   ;;  %s374_s15 = sphi %s410_s15, %s522_s15   ;;  %s370_s14 = sphi %s408_s14, %s521_s14  }
   0x6   : > { %s21_s19 = ssub.s32 %s382_s17, %s430_s18  ;;  %s24_s20 = sadd.s32 1, %s378_s16 }
   0x7   : > { %p22_p0 = scmp.eq.s32.totalorder %s21_s19, 0  ;;  %p31_p1 = scmp.ne.s32.totalorder %s378_s16, %s374_s15 }
   0x8   : > { %p32_p2 = scmp.eq.s32.totalorder %s382_s17, 0  ;;  %p37_p3 = scmp.ne.s32.totalorder %s374_s15, %s370_s14 }
   0x9   : > { %s440_s21 = scalar_select %p22_p0, %s378_s16, %s24_s20  }
   0xa   : > { %p33_p4 = por %p32_p2, %p31_p1  ;;  %p38_p5 = scmp.eq.s32.totalorder %s427_s2, 0 }
   0xb   : > { %p287_p6 = scmp.lt.s32.totalorder %s382_s17, 2  ;;  %s135_s23 = sand.u32 1, %s378_s16  }
   0xc   : > { %p444_p7 = por %p38_p5, %p37_p3  ;;  %s273_s24 = sshll.u32 %s135_s23, 3 }
   0xd   : > { %s274_s25 = sshll.u32 %s382_s17, 7  ;;  %s139_s29 = scalar_lea.vmem [#allocation3], %s273_s24 }
   0xe   : > { %s516_s22 = scalar_select %p444_p7, 1, 0 }
   0xf   : > { %s453_s28 = scalar_lea.hbm %s511_s0, %s274_s25  ;;  %s146_s30 = sshll.u32 %s139_s29, 4  ;;  %s455_s30 = int_to_ptr.vmem [resolvable:$true] %s146_s30 }
  0x10   : > { %p457_p8 = pnand %p287_p6, %p33_p4  ;;  %s136_s5 = scalar_lea.sflag [#allocation4], %s135_s23 }
  0x11   : > { %s320_s6 = scalar_lea.hbm %s453_s28, 128  ;;  %s325_s9 = scalar_lea.hbm %s511_s0, 256 }
  0x12   : > { %p321_p11 = scmp.ne.s32.totalorder %s453_s28, %s320_s6  ;;  %p322_p12 = pneg %p457_p8 }
  0x13   : > { %p326_p1 = scmp.lt.s32.totalorder %s453_s28, %s511_s0  ;;  %p327_p2 = scmp.lt.s32.totalorder %s325_s9, %s320_s6 }
  0x14   : > { %p323_p13 = pnand %p322_p12, %p321_p11 }
  0x15   : > { %p328_p3 = por %p327_p2, %p326_p1 }
  0x16   : > { %p324_p0 = pneg %p323_p13 }
  0x18   : > { %p329_p4 = pnand %p328_p3, %p324_p0 }
  0x1a   : > { %332 = shalt.err (!%p329_p4)
}
  0x1b   : > { %s333_s12 = scalar_lea.vmem %s455_s30, 128  ;;  %s384_s13 = smov [#allocation3]  }
  0x1c   : > { %p334_p5 = scmp.ne.s32.totalorder %s455_s30, %s333_s12  ;;  %s338_s14 = sshll.u32 %s384_s13, 4  ;;  %s339_s14 = int_to_ptr.vmem [resolvable:$false] %s338_s14 }
  0x1d   : > { %s340_s19 = scalar_lea.vmem %s339_s14, 256  ;;  %p341_p13 = scmp.lt.s32.totalorder %s455_s30, %s339_s14 }
  0x1e   : > { %p336_p6 = pnand %p334_p5, %p322_p12  ;;  %p342_p9 = scmp.lt.s32.totalorder %s340_s19, %s333_s12 }
  0x20   : > { %p337_p11 = pneg %p336_p6  ;;  %p343_p10 = por %p342_p9, %p341_p13 }
  0x22   : > { %p344_p7 = pnand %p343_p10, %p337_p11 }
  0x24   : > { %347 = shalt.err (!%p344_p7)
}
  0x25   : > { %286 = dma.hbm_to_vmem [thread:$0]  (!%p457_p8), %s453_s28, 128, %s455_s30, %s136_s5  }
  0x26   : > { %p518_p0 = scmp.lt.s32.totalorder %s382_s17, 3  ;;  %p519_p1 = scmp.ge.s32.totalorder %s382_s17, 1 }
  0x28   : > { %p152_p12 = pnand %p519_p1, %p518_p0 }
  0x29   : > { %s157_s20 = sand.u32 (!%p152_p12), 1, %s374_s15   ;;  %p520_p9 = scmp.ne.s32.totalorder (!%p152_p12), %s516_s22, 0 }
  0x2a   : > { %155 = sbr.rel (%p152_p12) target bundleno = 194 (0xc2), region = 32  ;;  %s276_s23 = sshll.u32 (!%p152_p12), %s157_s20, 3 }
  0x2b   : > { %s158_s24 = scalar_lea.sflag (!%p152_p12), [#allocation4], %s157_s20  ;;  %s161_s25 = scalar_lea.vmem (!%p152_p12), [#allocation3], %s276_s23 }
  0x2f   : > { %365 = dma.done.wait (%p520_p9), %s158_s24, 128  }
  0x30   : > { %367 = vsyncadd (%p520_p9), %s158_s24, 4294967168  ;;  %v187_v0 = vld [vmem:[%s161_s25] sm:$0xff]  ;;  %vm196_vm0 = vcmask 261120   ;;  %p183_p7 = scmp.lt.s32.totalorder %s427_s2, 1  ;;  %s200_s17 = sld [smem:[#allocation2]]  ;;  %vm203_vm1 = vcmask 7168  }
  0x31   : > { %v278_v1 = vld [vmem:[%s512_s1] ss:$0 sm:$0xff] }
  0x32   : > { %v195_v2 = vmul.f32 %v278_v1, %v187_v0  ;;  %s526_s2 = smov (!%p183_p7, %s427_s2), 1 }
  0x33   : > { %s277_s28 = sshll.u32 %s526_s2, 3 }
  0x34   : > { %v197_v3 = vsel %vm196_vm0, %v195_v2, 0.0  ;;  %s186_s22 = scalar_lea.vmem %s514_s3, %s277_s28 }
  0x35   : > { %198 = vadd.xlane.f32.xlu0 %v197_v3 }
  0x36   : > { %v201_v4 = vstv %s200_s17 }
  0xbe   : > { %v199_v5 = vpop.xlane.xlu0 %198 }
  0xbf   : > { %v202_v6 = vadd.f32 %v201_v4, %v199_v5 }
  0xc1   : > { %204 = vst.msk [vmem:[%s186_s22] sm:$0xff] %vm203_vm1, %v202_v6 }
  0xc2 PF: > { %p14_p8 = scmp.ge.s32.totalorder %s430_s18, 4   ;;  %s521_s14 = smov %s374_s15 }
  0xc3   : > { %s522_s15 = smov %s378_s16  ;;  %s523_s16 = smov %s440_s21 }
  0xc4   : > { %s524_s17 = smov %s430_s18  ;;  %16 = sbr.rel (!%p14_p8) target bundleno = 5 (0x5), region = 72 }
  0xc9   :  { %224 = vsyncpa [#allocation4], 1 }
  0xca   :  { %226 = vsyncpa [#allocation4 + $0x1], 1 }

// kernel: tpu_custom_call.1
= control target key start
LH: loop header
LB: loop body
LE: loop exit
PB: predicated region body
PF: predicated region fallthrough
CT: control target
= control target key end

     0   :  { %s511_s0 = inlined_call_operand.hbm [shape: f32[16,32], index: 0, kind: input, shape index: {}]   ;;  %s512_s1 = inlined_call_operand.vmem [shape: f32[1,32], index: 1, kind: input, shape index: {}]   ;;  %s513_s2 = inlined_call_operand.<no memory space> [shape: f32[1,1], index: 2, kind: input, shape index: {}]   ;;  %s514_s3 = inlined_call_operand.vmem [shape: f32[16,1], index: 3, kind: output, shape index: {}]  }
   0x1   :  { %8 = sst [smem:[#allocation2]] %s513_s2 }
   0x2   :  { %9 = vsyncpa [#allocation4], 0 }
   0x3   :  { %11 = vsyncpa [#allocation4 + $0x1], 0  ;;  %s408_s14 = smov 0   ;;  %s410_s15 = smov 0  }
   0x4   :  { %s412_s16 = smov 0   ;;  %s414_s17 = smov 0  }
   0x5 LB: > { %s427_s2 = sadd.s32 4294967295, %s382_s17   ;;  %s430_s18 = sadd.s32 1, %s382_s17   ;;  %s382_s17 = sphi %s414_s17, %s524_s17   ;;  %s378_s16 = sphi %s412_s16, %s523_s16   ;;  %s374_s15 = sphi %s410_s15, %s522_s15   ;;  %s370_s14 = sphi %s408_s14, %s521_s14  }
   0x6   : > { %s21_s19 = ssub.s32 %s382_s17, %s430_s18  ;;  %s24_s20 = sadd.s32 1, %s378_s16 }
   0x7   : > { %p22_p0 = scmp.eq.s32.totalorder %s21_s19, 0  ;;  %p31_p1 = scmp.ne.s32.totalorder %s378_s16, %s374_s15 }
   0x8   : > { %p32_p2 = scmp.eq.s32.totalorder %s382_s17, 0  ;;  %p37_p3 = scmp.ne.s32.totalorder %s374_s15, %s370_s14 }
   0x9   : > { %s440_s21 = scalar_select %p22_p0, %s378_s16, %s24_s20  }
   0xa   : > { %p33_p4 = por %p32_p2, %p31_p1  ;;  %p38_p5 = scmp.eq.s32.totalorder %s427_s2, 0 }
   0xb   : > { %p287_p6 = scmp.lt.s32.totalorder %s382_s17, 2  ;;  %s135_s23 = sand.u32 1, %s378_s16  }
   0xc   : > { %p444_p7 = por %p38_p5, %p37_p3  ;;  %s273_s24 = sshll.u32 %s135_s23, 3 }
   0xd   : > { %s274_s25 = sshll.u32 %s382_s17, 7  ;;  %s139_s29 = scalar_lea.vmem [#allocation3], %s273_s24 }
   0xe   : > { %s516_s22 = scalar_select %p444_p7, 1, 0 }
   0xf   : > { %s453_s28 = scalar_lea.hbm %s511_s0, %s274_s25  ;;  %s146_s30 = sshll.u32 %s139_s29, 4  ;;  %s455_s30 = int_to_ptr.vmem [resolvable:$true] %s146_s30 }
  0x10   : > { %p457_p8 = pnand %p287_p6, %p33_p4  ;;  %s136_s5 = scalar_lea.sflag [#allocation4], %s135_s23 }
  0x11   : > { %s320_s6 = scalar_lea.hbm %s453_s28, 128  ;;  %s325_s9 = scalar_lea.hbm %s511_s0, 256 }
  0x12   : > { %p321_p11 = scmp.ne.s32.totalorder %s453_s28, %s320_s6  ;;  %p322_p12 = pneg %p457_p8 }
  0x13   : > { %p326_p1 = scmp.lt.s32.totalorder %s453_s28, %s511_s0  ;;  %p327_p2 = scmp.lt.s32.totalorder %s325_s9, %s320_s6 }
  0x14   : > { %p323_p13 = pnand %p322_p12, %p321_p11 }
  0x15   : > { %p328_p3 = por %p327_p2, %p326_p1 }
  0x16   : > { %p324_p0 = pneg %p323_p13 }
  0x18   : > { %p329_p4 = pnand %p328_p3, %p324_p0 }
  0x1a   : > { %332 = shalt.err (!%p329_p4)
}
  0x1b   : > { %s333_s12 = scalar_lea.vmem %s455_s30, 128  ;;  %s384_s13 = smov [#allocation3]  }
  0x1c   : > { %p334_p5 = scmp.ne.s32.totalorder %s455_s30, %s333_s12  ;;  %s338_s14 = sshll.u32 %s384_s13, 4  ;;  %s339_s14 = int_to_ptr.vmem [resolvable:$false] %s338_s14 }
  0x1d   : > { %s340_s19 = scalar_lea.vmem %s339_s14, 256  ;;  %p341_p13 = scmp.lt.s32.totalorder %s455_s30, %s339_s14 }
  0x1e   : > { %p336_p6 = pnand %p334_p5, %p322_p12  ;;  %p342_p9 = scmp.lt.s32.totalorder %s340_s19, %s333_s12 }
  0x20   : > { %p337_p11 = pneg %p336_p6  ;;  %p343_p10 = por %p342_p9, %p341_p13 }
  0x22   : > { %p344_p7 = pnand %p343_p10, %p337_p11 }
  0x24   : > { %347 = shalt.err (!%p344_p7)
}
  0x25   : > { %286 = dma.hbm_to_vmem [thread:$0]  (!%p457_p8), %s453_s28, 128, %s455_s30, %s136_s5  }
  0x26   : > { %p518_p0 = scmp.lt.s32.totalorder %s382_s17, 3  ;;  %p519_p1 = scmp.ge.s32.totalorder %s382_s17, 1 }
  0x28   : > { %p152_p12 = pnand %p519_p1, %p518_p0 }
  0x29   : > { %s157_s20 = sand.u32 (!%p152_p12), 1, %s374_s15   ;;  %p520_p9 = scmp.ne.s32.totalorder (!%p152_p12), %s516_s22, 0 }
  0x2a   : > { %155 = sbr.rel (%p152_p12) target bundleno = 194 (0xc2), region = 32  ;;  %s276_s23 = sshll.u32 (!%p152_p12), %s157_s20, 3 }
  0x2b   : > { %s158_s24 = scalar_lea.sflag (!%p152_p12), [#allocation4], %s157_s20  ;;  %s161_s25 = scalar_lea.vmem (!%p152_p12), [#allocation3], %s276_s23 }
  0x2f   : > { %365 = dma.done.wait (%p520_p9), %s158_s24, 128  }
  0x30   : > { %367 = vsyncadd (%p520_p9), %s158_s24, 4294967168  ;;  %v187_v0 = vld [vmem:[%s161_s25] sm:$0xff]  ;;  %vm196_vm0 = vcmask 261120   ;;  %p183_p7 = scmp.lt.s32.totalorder %s427_s2, 1  ;;  %s200_s17 = sld [smem:[#allocation2]]  ;;  %vm203_vm1 = vcmask 7168  }
  0x31   : > { %v278_v1 = vld [vmem:[%s512_s1] ss:$0 sm:$0xff] }
  0x32   : > { %v195_v2 = vmul.f32 %v278_v1, %v187_v0  ;;  %s526_s2 = smov (!%p183_p7, %s427_s2), 1 }
  0x33   : > { %s277_s28 = sshll.u32 %s526_s2, 3 }
  0x34   : > { %v197_v3 = vsel %vm196_vm0, %v195_v2, 0.0  ;;  %s186_s22 = scalar_lea.vmem %s514_s3, %s277_s28 }
  0x35   : > { %198 = vadd.xlane.f32.xlu0 %v197_v3 }
  0x36   : > { %v201_v4 = vstv %s200_s17 }
  0xbe   : > { %v199_v5 = vpop.xlane.xlu0 %198 }
  0xbf   : > { %v202_v6 = vadd.f32 %v201_v4, %v199_v5 }
  0xc1   : > { %204 = vst.msk [vmem:[%s186_s22] sm:$0xff] %vm203_vm1, %v202_v6 }
  0xc2 PF: > { %p14_p8 = scmp.ge.s32.totalorder %s430_s18, 4   ;;  %s521_s14 = smov %s374_s15 }
  0xc3   : > { %s522_s15 = smov %s378_s16  ;;  %s523_s16 = smov %s440_s21 }
  0xc4   : > { %s524_s17 = smov %s430_s18  ;;  %16 = sbr.rel (!%p14_p8) target bundleno = 5 (0x5), region = 72 }
  0xc9   :  { %224 = vsyncpa [#allocation4], 1 }
  0xca   :  { %226 = vsyncpa [#allocation4 + $0x1], 1 }

</bundles_post_ra>
